<compile_context>
chip_gen: v5e
topology: v5e:2x2
jax: 0.10.0
libtpu: 0.0.40
codegen_flags: <defaults>
</compile_context>

<pallas_src>
import numpy as np
import jax
import jax.numpy as jnp
from jax.experimental import pallas as pl
from jax.experimental.pallas import tpu as pltpu

_LANES = 128          # vreg lane width: the edge axis maps onto lanes
_MIN_SUB = 8          # sublane granularity for the (8, 128) tiling constraint
_TILE_ROWS = 2048     # sublane rows per grid step -> 2048*128 = 262144 edges/tile


def _cdiv(a: int, b: int) -> int:
    return -(-a // b)


def compute_full_right_index(edge_index: np.ndarray) -> np.ndarray:
    """full_matrix=True variant of lap.compute_left_right_map_index:
    for each directed edge e=(u,v), the index of its reverse edge (v,u).
    Only used by the self-test reference; the kernel data path no longer
    needs this index thanks to the reverse-pair identity."""
    E = edge_index.shape[1]
    e2i = {(int(edge_index[0, e]), int(edge_index[1, e])): e for e in range(E)}
    right = [e2i[(int(edge_index[1, e]), int(edge_index[0, e]))] for e in range(E)]
    return np.asarray(right, dtype=np.int32)


def _edge_weight_kernel(s_ref, sr_ref, out_ref):
    # Lane-dense per-edge hot path on [tile_rows, 128] slabs of edges:
    #   sigmoid(s) * sigmoid(s_rev) == 1 / ((1 + exp(-s)) * (1 + exp(-s_rev)))
    # 2 exp (EUP) + 1 approx reciprocal (EUP) + adds/mul on the VPU.
    s = s_ref[...]
    sr = sr_ref[...]
    denom = (1.0 + jnp.exp(-s)) * (1.0 + jnp.exp(-sr))
    out_ref[...] = pl.reciprocal(denom, approx=True).astype(out_ref.dtype)


def edge_weight_learner_forward(x, edge_index, lin_weight):
    """x: [N, C] f32; edge_index: [2, E] i32; lin_weight: [1, 2C] f32 (the
    torch Linear(2C, 1, bias=False).weight).
    Assumes every directed edge's reverse edge is present (full_matrix=True,
    as the PyTorch module requires).
    Returns edge_weights [E, 1] f32 (same shape/values as the PyTorch module)."""
    N, C = x.shape
    E = edge_index.shape[1]
    row, col = edge_index[0], edge_index[1]

    # ---- Glue (plain JAX): one per-node GEMM + O(E) scalar gathers ----
    # Linear(2C->1) on cat([x[row], x[col]]) == p_src[row] + p_dst[col].
    w_cols = jnp.stack([lin_weight[0, :C], lin_weight[0, C:]], axis=1)  # [C, 2]
    p = x @ w_cols                                                      # [N, 2]
    p_src, p_dst = p[:, 0], p[:, 1]

    s = jnp.take(p_src, row) + jnp.take(p_dst, col)        # [E] pre-activation
    # Reverse-pair identity (no full_right_idx gather needed):
    #   s_rev[e] = s[full_right_idx[e]] = p_src[col[e]] + p_dst[row[e]]
    s_rev = jnp.take(p_src, col) + jnp.take(p_dst, row)    # [E]

    # ---- Lane-dense layout: pad E and reshape to [rows, 128] slabs ----
    rows_needed = max(1, _cdiv(E, _LANES))
    if rows_needed >= 2 * _TILE_ROWS:
        tile_rows = _TILE_ROWS
    elif rows_needed >= 2 * _MIN_SUB:
        # Split into >= 2 tiles so both v7x TensorCores get work.
        tile_rows = _cdiv(_cdiv(rows_needed, 2), _MIN_SUB) * _MIN_SUB
    else:
        tile_rows = _MIN_SUB
    rows = _cdiv(rows_needed, tile_rows) * tile_rows
    e_pad = rows * _LANES

    def to_slab(v):
        return jnp.pad(v, (0, e_pad - E)).reshape(rows, _LANES)

    s_slab = to_slab(s)
    sr_slab = to_slab(s_rev)

    edge_spec = pl.BlockSpec((tile_rows, _LANES), lambda i: (i, 0))

    cost = pl.CostEstimate(
        flops=5 * e_pad,                 # negates, adds, final mul per edge
        transcendentals=3 * e_pad,       # 2 exp + 1 reciprocal per edge
        bytes_accessed=3 * e_pad * 4,    # 2 f32 inputs + 1 f32 output
    )

    out_slab = pl.pallas_call(
        _edge_weight_kernel,
        out_shape=jax.ShapeDtypeStruct((rows, _LANES), x.dtype),
        grid=(rows // tile_rows,),
        in_specs=[edge_spec, edge_spec],
        out_specs=edge_spec,
        compiler_params=pltpu.CompilerParams(
            dimension_semantics=("parallel",)),
        cost_estimate=cost,
    )(s_slab, sr_slab)

    # Strip padding and restore the [E, 1] shape of the PyTorch output.
    return out_slab.reshape(e_pad)[:E].reshape(E, 1)


if __name__ == "__main__":
    # Small deterministic example: 8 nodes, in_channels=8, 8 undirected edges
    # -> 16 directed edges (every edge has its reverse present, as the
    # full_matrix=True mapping requires).
    N, C = 8, 8
    und = [(0, 1), (1, 2), (2, 3), (3, 0), (0, 2), (1, 3), (4, 5), (5, 6)]
    src = [u for u, v in und] + [v for u, v in und]
    dst = [v for u, v in und] + [u for u, v in und]
    edge_index_np = np.asarray([src, dst], dtype=np.int32)          # [2, 16]
    full_right_idx_np = compute_full_right_index(edge_index_np)     # [16]

    key = jax.random.PRNGKey(0)
    kx, kw = jax.random.split(key)
    x = jax.random.normal(kx, (N, C), dtype=jnp.float32)
    # Deterministic init of nn.Linear(2C, 1, bias=False) weight, shape [1, 2C].
    lin_weight = (jax.random.normal(kw, (1, 2 * C), dtype=jnp.float32)
                  * (1.0 / np.sqrt(2 * C)))

    edge_index = jnp.asarray(edge_index_np)

    out = edge_weight_learner_forward(x, edge_index, lin_weight)
    out = jax.block_until_ready(out)

    # Pure-JAX reference (matches the PyTorch forward exactly).
    xs = x[edge_index[0]]
    xd = x[edge_index[1]]
    w_ref = jax.nn.sigmoid(jnp.concatenate([xs, xd], axis=1) @ lin_weight.T)
    ref = w_ref * w_ref[jnp.asarray(full_right_idx_np)]
    assert out.shape == (edge_index.shape[1], 1)
    # Tolerance loosened to 2e-3 for the approx-reciprocal fused sigmoid product.
    assert np.allclose(np.asarray(out), np.asarray(ref), atol=2e-3, rtol=2e-3)

    print("KERNEL_OK")
</pallas_src>

<mosaic_0001>
module attributes {stable_mosaic.version = 11 : i64} {
  func.func @_edge_weight_kernel(%arg0: i32, %arg1: memref<8x128xf32, #tpu.memory_space<vmem>>, %arg2: memref<8x128xf32, #tpu.memory_space<vmem>>, %arg3: memref<8x128xf32, #tpu.memory_space<vmem>>) attributes {dimension_semantics = [#tpu.dimension_semantics<parallel>], iteration_bounds = array<i64: 1>, scalar_prefetch = 0 : i64, scratch_operands = 0 : i64, tpu.core_type = #tpu.core_type<tc>, window_params = [{transform_indices = @transform_0, window_bounds = array<i64: 8, 128>}, {transform_indices = @transform_1, window_bounds = array<i64: 8, 128>}, {transform_indices = @transform_2, window_bounds = array<i64: 8, 128>}]} {
    %c0 = arith.constant 0 : index
    %c0_0 = arith.constant 0 : index
    %0 = vector.load %arg1[%c0, %c0_0] : memref<8x128xf32, #tpu.memory_space<vmem>>, vector<8x128xf32>
    %c0_1 = arith.constant 0 : index
    %c0_2 = arith.constant 0 : index
    %1 = vector.load %arg2[%c0_1, %c0_2] : memref<8x128xf32, #tpu.memory_space<vmem>>, vector<8x128xf32>
    %cst = arith.constant 0.000000e+00 : f32
    %2 = vector.broadcast %cst : f32 to vector<8x128xf32>
    %3 = arith.subf %2, %0 : vector<8x128xf32>
    %4 = math.exp %3 : vector<8x128xf32>
    %cst_3 = arith.constant 1.000000e+00 : f32
    %5 = vector.broadcast %cst_3 : f32 to vector<8x128xf32>
    %6 = arith.addf %5, %4 : vector<8x128xf32>
    %cst_4 = arith.constant 0.000000e+00 : f32
    %7 = vector.broadcast %cst_4 : f32 to vector<8x128xf32>
    %8 = arith.subf %7, %1 : vector<8x128xf32>
    %9 = math.exp %8 : vector<8x128xf32>
    %cst_5 = arith.constant 1.000000e+00 : f32
    %10 = vector.broadcast %cst_5 : f32 to vector<8x128xf32>
    %11 = arith.addf %10, %9 : vector<8x128xf32>
    %12 = arith.mulf %6, %11 : vector<8x128xf32>
    %13 = tpu.reciprocal %12 {approx = true} : vector<8x128xf32> -> vector<8x128xf32>
    %c0_6 = arith.constant 0 : index
    %c0_7 = arith.constant 0 : index
    %14 = vector.load %arg3[%c0_6, %c0_7] : memref<8x128xf32, #tpu.memory_space<vmem>>, vector<8x128xf32>
    tpu.vector_store %arg3[%c0_6, %c0_7], %13 {strides = array<i32>} : memref<8x128xf32, #tpu.memory_space<vmem>>, vector<8x128xf32>,
    return
  }
  func.func @transform_0(%arg0: i32) -> (i32, i32) {
    %c0_i32 = arith.constant 0 : i32
    %c0_i32_0 = arith.constant 0 : i32
    return %arg0, %c0_i32 : i32, i32
  }
  func.func @transform_1(%arg0: i32) -> (i32, i32) {
    %c0_i32 = arith.constant 0 : i32
    %c0_i32_0 = arith.constant 0 : i32
    return %arg0, %c0_i32 : i32, i32
  }
  func.func @transform_2(%arg0: i32) -> (i32, i32) {
    %c0_i32 = arith.constant 0 : i32
    %c0_i32_0 = arith.constant 0 : i32
    return %arg0, %c0_i32 : i32, i32
  }
}

</mosaic_0001>

<bundles_post_ra>
// kernel: tpu_custom_call.1
= control target key start
LH: loop header
LB: loop body
LE: loop exit
PB: predicated region body
PF: predicated region fallthrough
CT: control target
= control target key end

     0   :  { %7 = vsyncpa [#allocation3], 0  ;;  %s185_s0 = inlined_call_operand.hbm [shape: f32[8,128], index: 0, kind: input, shape index: {}]   ;;  %s186_s1 = inlined_call_operand.hbm [shape: f32[8,128], index: 1, kind: input, shape index: {}]   ;;  %s187_s2 = inlined_call_operand.hbm [shape: f32[8,128], index: 2, kind: output, shape index: {}]  }
   0x1   :  { %8 = vsyncpa [#allocation6], 0 }
   0x2   :  { %9 = vsyncpa [#allocation4], 0  ;;  %s15_s11 = sshll.u32 %s185_s0, 4  ;;  %s158_s12 = smov [#allocation2]   ;;  %s16_s11 = int_to_ptr.hbm [resolvable:$true] %s15_s11 }
   0x3   :  { %s17_s13 = sshll.u32 %s158_s12, 4  ;;  %s26_s16 = sshll.u32 %s186_s1, 4  ;;  %s18_s13 = int_to_ptr.vmem [resolvable:$true] %s17_s13  ;;  %s27_s16 = int_to_ptr.hbm [resolvable:$true] %s26_s16 }
   0x4   :  { %20 = dma.hbm_to_vmem [thread:$0]  %s16_s11, 128, %s18_s13, [#allocation3]  }
   0x5   :  { %s159_s17 = smov [#allocation5]  }
   0x6   :  { %s28_s18 = sshll.u32 %s159_s17, 4  ;;  %s29_s18 = int_to_ptr.vmem [resolvable:$true] %s28_s18 }
   0x7   :  { %31 = dma.hbm_to_vmem [thread:$0]  %s27_s16, 128, %s29_s18, [#allocation6]  }
   0x8   :  { %152 = dma.done.wait [#allocation3], 128  }
   0x9   :  { %153 = vsyncadd [#allocation3], 4294967168 }
   0xa   :  { %154 = dma.done.wait [#allocation6], 128  }
   0xb   :  { %155 = vsyncadd [#allocation6], 4294967168  ;;  %v40_v0 = vld [vmem:[#allocation2] sm:$0xff]  ;;  %v41_v1 = vld [vmem:[#allocation5] sm:$0xff]  ;;  %s160_s0 = smov [#allocation7]   ;;  %s60_s21 = sshll.u32 %s187_s2, 4  ;;  %s61_s21 = int_to_ptr.hbm [resolvable:$true] %s60_s21 }
   0xc   :  { %v42_v2 = vsub.f32 0.0, %v40_v0  ;;  %v46_v3 = vsub.f32 0.0, %v41_v1  ;;  %s58_s1 = sshll.u32 %s160_s0, 4  ;;  %s59_s1 = int_to_ptr.vmem [resolvable:$true] %s58_s1 }
   0xe   :  { %v43_v4 = vmul.f32 1.442695, %v42_v2  ;;  %v47_v5 = vmul.f32 1.442695, %v46_v3 }
  0x10   :  { %74 = vpow2.f32 %v43_v4 }
  0x11   :  { %76 = vpow2.f32 %v47_v5 }
  0x16   :  { %v75_v6 = vpop.eup %74 }
  0x17   :  { %v77_v7 = vpop.eup %76  ;;  %v45_v8 = vadd.f32 1.0, %v75_v6 }
  0x18   :  { %v49_v9 = vadd.f32 1.0, %v77_v7 }
  0x1a   :  { %v50_v10 = vmul.f32 %v49_v9, %v45_v8 }
  0x1c   :  { %78 = vrcp.f32 %v50_v10 }
  0x22   :  { %v79_v11 = vpop.eup %78 }
  0x23   :  { %52 = vst [vmem:[#allocation7] sm:$0xff] %v79_v11 }
  0x24   :  { %63 = dma.vmem_to_hbm [thread:$0]  %s59_s1, 128, %s61_s21, [#allocation4]  }
  0x25   :  { %156 = dma.done.wait [#allocation4], 128  }
  0x26   :  { %157 = vsyncadd [#allocation4], 4294967168 }
  0x27   :  { %68 = vsyncpa [#allocation3], 1 }
  0x28   :  { %69 = vsyncpa [#allocation6], 1 }
  0x29   :  { %70 = vsyncpa [#allocation4], 1 }

</bundles_post_ra>
